<compile_context>
chip_gen: v7x
topology: tpu7x:2x2x1
jax: 0.10.0
libtpu: 0.0.40
codegen_flags: <defaults>
</compile_context>

<pallas_src>
import jax
import jax.numpy as jnp
from jax.experimental import pallas as pl
from jax.experimental.pallas import tpu as pltpu


def _swd7_kernel(v_ref, mask_ref, out_ref):
    # v_ref/out_ref : (1, S, TD)  (S on sublanes, features on lanes)
    # mask_ref      : (1, S, 1)   int32, nonzero = masked (zero the whole row)
    v = v_ref[...].astype(jnp.float32)                    # (1, S, TD)
    s = v.shape[1]
    row = jax.lax.broadcasted_iota(jnp.int32, v.shape, dimension=1)

    vmax = jnp.max(v, axis=1, keepdims=True)              # (1, 1, TD) column max
    # first argmax row per feature column (matches torch.max tie handling)
    amax = jnp.min(jnp.where(v == vmax, row, s), axis=1, keepdims=True)

    v_cls = v[:, 0:1, :]                                  # (1, 1, TD) original CLS row
    # row 0 gets the column max, the (first) argmax row gets the old CLS value;
    # when amax == 0 both writes carry the same value, matching PyTorch ordering.
    swapped = jnp.where(row == amax, v_cls, jnp.where(row == 0, vmax, v))

    mask = mask_ref[...]                                  # (1, S, 1)
    out_ref[...] = jnp.where(mask != 0, 0.0, swapped).astype(out_ref.dtype)


def _choose_feature_tile(d, max_td=512):
    """Lane-dense feature tile: multiple of 128 dividing d, capped for VMEM."""
    if d <= max_td:
        return d
    for td in (512, 384, 256, 128):
        if td <= max_td and d % td == 0:
            return td
    return d  # no lane-aligned divisor; fall back to the full feature dim


def swd7_pallas(q, k, v, attn_mask, stage="train"):
    """Pallas implementation of SWD7.forward(q, k, v, attn_mask)."""
    del q, k, stage                                       # unused by SWD7.forward
    B, H, S, D = v.shape
    assert attn_mask.shape[-1] == S

    vf = v.reshape(B * H, S, D)
    # Only query-row 0 of the mask is ever used by the module.
    mask_row = attn_mask[:, :, 0, :].reshape(B * H, S, 1).astype(jnp.int32)

    TD = _choose_feature_tile(D)
    grid = (B * H, D // TD)

    out = pl.pallas_call(
        _swd7_kernel,
        out_shape=jax.ShapeDtypeStruct((B * H, S, D), v.dtype),
        grid=grid,
        in_specs=[
            pl.BlockSpec((1, S, TD), lambda b, d: (b, 0, d)),
            pl.BlockSpec((1, S, 1), lambda b, d: (b, 0, 0)),
        ],
        out_specs=pl.BlockSpec((1, S, TD), lambda b, d: (b, 0, d)),
        compiler_params=pltpu.CompilerParams(
            dimension_semantics=("parallel", "parallel")),
    )(vf, mask_row)

    return out.reshape(B, H, S, D), None


def swd7_reference(q, k, v, attn_mask):
    """Pure-JAX reference matching the PyTorch module's forward."""
    del q, k
    B, H, S, D = v.shape
    values = jnp.max(v, axis=-2)                          # (B, H, D)
    idx = jnp.argmax(v, axis=-2)                          # first max index
    v_cls = v[:, :, 0, :]                                 # (B, H, D)
    new_v = v.at[:, :, 0, :].set(values)
    row = jnp.arange(S)[None, None, :, None]
    new_v = jnp.where(row == idx[:, :, None, :], v_cls[:, :, None, :], new_v)
    mask = attn_mask[:, :, 0, :][:, :, :, None]
    return jnp.where(mask, 0.0, new_v).astype(v.dtype)


if __name__ == "__main__":
    key = jax.random.PRNGKey(0)
    kq, kk, kv, km = jax.random.split(key, 4)

    batch, n_heads, seq, d_k = 2, 2, 8, 16
    q = jax.random.normal(kq, (batch, n_heads, seq, d_k), dtype=jnp.float32)
    k = jax.random.normal(kk, (batch, n_heads, seq, d_k), dtype=jnp.float32)
    v = jax.random.normal(kv, (batch, n_heads, seq, d_k), dtype=jnp.float32)
    attn_mask = jax.random.bernoulli(km, p=0.2, shape=(batch, n_heads, seq, seq))

    out, attn = swd7_pallas(q, k, v, attn_mask)
    out = jax.block_until_ready(out)

    ref = swd7_reference(q, k, v, attn_mask)
    assert out.shape == v.shape
    assert attn is None
    assert jnp.allclose(out, ref, atol=1e-6, rtol=1e-6), "mismatch vs reference"

    print("KERNEL_OK")
</pallas_src>

<mosaic_0001>
module attributes {stable_mosaic.version = 11 : i64} {
  func.func @_swd7_kernel(%arg0: i32, %arg1: i32, %arg2: memref<1x8x16xf32, #tpu.memory_space<vmem>>, %arg3: memref<1x8x1xi32, #tpu.memory_space<vmem>>, %arg4: memref<1x8x16xf32, #tpu.memory_space<vmem>>) attributes {dimension_semantics = [#tpu.dimension_semantics<parallel>, #tpu.dimension_semantics<parallel>], iteration_bounds = array<i64: 4, 1>, scalar_prefetch = 0 : i64, scratch_operands = 0 : i64, tpu.core_type = #tpu.core_type<tc>, window_params = [{transform_indices = @transform_0, window_bounds = array<i64: 1, 8, 16>}, {transform_indices = @transform_1, window_bounds = array<i64: 1, 8, 1>}, {transform_indices = @transform_2, window_bounds = array<i64: 1, 8, 16>}]} {
    %c0 = arith.constant 0 : index
    %c0_0 = arith.constant 0 : index
    %c0_1 = arith.constant 0 : index
    %0 = vector.load %arg2[%c0, %c0_0, %c0_1] : memref<1x8x16xf32, #tpu.memory_space<vmem>>, vector<1x8x16xf32>
    %1 = tpu.iota {dimensions = array<i32: 1>} : vector<1x8x16xi32>
    %cst = arith.constant dense<0xFF800000> : vector<1x16xf32>
    %2 = vector.multi_reduction <maximumf>, %0, %cst [1] : vector<1x8x16xf32> to vector<1x16xf32>
    %3 = vector.shape_cast %2 : vector<1x16xf32> to vector<1x1x16xf32>
    %4 = vector.broadcast %3 : vector<1x1x16xf32> to vector<1x8x16xf32>
    %5 = arith.cmpf oeq, %0, %4 : vector<1x8x16xf32>
    %c8_i32 = arith.constant 8 : i32
    %6 = vector.broadcast %c8_i32 : i32 to vector<1x8x16xi32>
    %7 = arith.select %5, %1, %6 : vector<1x8x16xi1>, vector<1x8x16xi32>
    %cst_2 = arith.constant dense<2147483647> : vector<1x16xi32>
    %8 = vector.multi_reduction <minsi>, %7, %cst_2 [1] : vector<1x8x16xi32> to vector<1x16xi32>
    %9 = vector.shape_cast %8 : vector<1x16xi32> to vector<1x1x16xi32>
    %10 = vector.extract_strided_slice %0 {offsets = [0, 0, 0], sizes = [1, 1, 16], strides = [1, 1, 1]} : vector<1x8x16xf32> to vector<1x1x16xf32>
    %11 = vector.broadcast %9 : vector<1x1x16xi32> to vector<1x8x16xi32>
    %12 = arith.cmpi eq, %1, %11 : vector<1x8x16xi32>
    %c0_i32 = arith.constant 0 : i32
    %13 = vector.broadcast %c0_i32 : i32 to vector<1x8x16xi32>
    %14 = arith.cmpi eq, %1, %13 : vector<1x8x16xi32>
    %15 = vector.shape_cast %3 : vector<1x1x16xf32> to vector<1x1x16xf32>
    %16 = vector.broadcast %15 : vector<1x1x16xf32> to vector<1x8x16xf32>
    %17 = arith.select %14, %16, %0 : vector<1x8x16xi1>, vector<1x8x16xf32>
    %18 = vector.shape_cast %10 : vector<1x1x16xf32> to vector<1x1x16xf32>
    %19 = vector.broadcast %18 : vector<1x1x16xf32> to vector<1x8x16xf32>
    %20 = arith.select %12, %19, %17 : vector<1x8x16xi1>, vector<1x8x16xf32>
    %c0_3 = arith.constant 0 : index
    %c0_4 = arith.constant 0 : index
    %c0_5 = arith.constant 0 : index
    %21 = vector.load %arg3[%c0_3, %c0_4, %c0_5] : memref<1x8x1xi32, #tpu.memory_space<vmem>>, vector<1x8x1xi32>
    %c0_i32_6 = arith.constant 0 : i32
    %22 = vector.broadcast %c0_i32_6 : i32 to vector<1x8x1xi32>
    %23 = arith.cmpi ne, %21, %22 : vector<1x8x1xi32>
    %cst_7 = arith.constant 0.000000e+00 : f32
    %24 = vector.shape_cast %23 : vector<1x8x1xi1> to vector<1x8x1xi1>
    %25 = vector.broadcast %24 : vector<1x8x1xi1> to vector<1x8x16xi1>
    %26 = vector.broadcast %cst_7 : f32 to vector<1x8x16xf32>
    %27 = arith.select %25, %26, %20 : vector<1x8x16xi1>, vector<1x8x16xf32>
    %c0_8 = arith.constant 0 : index
    %c0_9 = arith.constant 0 : index
    %c0_10 = arith.constant 0 : index
    %28 = vector.load %arg4[%c0_8, %c0_9, %c0_10] : memref<1x8x16xf32, #tpu.memory_space<vmem>>, vector<1x8x16xf32>
    tpu.vector_store %arg4[%c0_8, %c0_9, %c0_10], %27 {strides = array<i32>} : memref<1x8x16xf32, #tpu.memory_space<vmem>>, vector<1x8x16xf32>,
    return
  }
  func.func @transform_0(%arg0: i32, %arg1: i32) -> (i32, i32, i32) {
    %c0_i32 = arith.constant 0 : i32
    %c0_i32_0 = arith.constant 0 : i32
    return %arg0, %c0_i32, %arg1 : i32, i32, i32
  }
  func.func @transform_1(%arg0: i32, %arg1: i32) -> (i32, i32, i32) {
    %c0_i32 = arith.constant 0 : i32
    %c0_i32_0 = arith.constant 0 : i32
    %c0_i32_1 = arith.constant 0 : i32
    return %arg0, %c0_i32, %c0_i32_0 : i32, i32, i32
  }
  func.func @transform_2(%arg0: i32, %arg1: i32) -> (i32, i32, i32) {
    %c0_i32 = arith.constant 0 : i32
    %c0_i32_0 = arith.constant 0 : i32
    return %arg0, %c0_i32, %arg1 : i32, i32, i32
  }
}

</mosaic_0001>

<bundles_post_ra>
// kernel: tpu_custom_call.1
= control target key start
LH: loop header
LB: loop body
LE: loop exit
PB: predicated region body
PF: predicated region fallthrough
CT: control target
= control target key end

     0   :  { %7 = vsyncpa [#allocation3], 0  ;;  %s603_s0 = inlined_call_operand.vmem [shape: f32[4,8,16], index: 0, kind: input, shape index: {}]   ;;  %s604_s1 = inlined_call_operand.vmem [shape: s32[4,8,1], index: 1, kind: input, shape index: {}]   ;;  %s605_s2 = inlined_call_operand.hbm [shape: f32[4,8,16], index: 2, kind: output, shape index: {}]  }
   0x1   :  { %9 = vsyncpa [#allocation3 + $0x1], 0  ;;  %s485_s9 = smov 0   ;;  %s487_s10 = smov 0  }
   0x2   :  { %s489_s11 = smov 0   ;;  %s491_s12 = smov 0  }
   0x3   :  { %s493_s13 = smov 0   ;;  %s495_s14 = smov 0  }
   0x4 LB: > { %s319_s15 = sadd.s32 4294967295, %s466_s14   ;;  %s320_s16 = sadd.s32 4294967294, %s466_s14   ;;  %s466_s14 = sphi %s495_s14, %s15_s14   ;;  %s462_s13 = sphi %s493_s13, %s612_s13   ;;  %s458_s12 = sphi %s491_s12, %s611_s12   ;;  %s454_s11 = sphi %s489_s11, %s610_s11   ;;  %s450_s10 = sphi %s487_s10, %s609_s10   ;;  %s446_s9 = sphi %s485_s9, %s608_s9  }
   0x5   : > { %s27_s17 = sadd.s32 1, %s462_s13  ;;  %s90_s18 = sadd.s32 1, %s454_s11 }
   0x6   : > { %p29_p0 = scmp.ge.s32.totalorder %s27_s17, 4  ;;  %p100_p1 = scmp.ne.s32.totalorder %s454_s11, %s450_s10 }
   0x7   : > { %p101_p2 = scmp.eq.s32.totalorder %s319_s15, 3  ;;  %p106_p3 = scmp.ne.s32.totalorder %s450_s10, %s446_s9 }
   0x8   : > { %s614_s17 = smov (%p29_p0, %s27_s17), 0  ;;  %p107_p5 = scmp.eq.s32.totalorder %s320_s16, 3 }
   0x9   : > { %p525_p4 = por %p101_p2, %p100_p1  ;;  %s85_s20 = ssub.s32 %s462_s13, %s614_s17 }
   0xa   : > { %p323_p6 = scmp.ge.s32.totalorder %s466_s14, 1  ;;  %p88_p7 = scmp.eq.s32.totalorder %s85_s20, 0 }
   0xb   : > { %p532_p8 = por %p107_p5, %p106_p3  ;;  %p142_p9 = scmp.lt.s32.totalorder %s466_s14, 5 }
   0xc   : > { %s538_s22 = scalar_select %p88_p7, %s454_s11, %s90_s18  }
   0xd   : > { %p143_p10 = pnand %p323_p6, %p142_p9 }
   0xe   : > { %p170_p11 = scmp.lt.s32.totalorder (!%p143_p10), %s458_s12, 3  ;;  %v468_v0 = vmov (!%p143_p10), 0   ;;  %vm184_vm1 = vcmask (!%p143_p10), 130048   ;;  %v182_v10 = vlaneseq (!%p143_p10)  ;;  %s167_s3 = sand.u32 (!%p143_p10), 1, %s450_s10  }
   0xf   : > { %146 = sbr.rel (%p143_p10) target bundleno = 173 (0xad), region = 28  ;;  %387 = vset.pattern.permute.xlu0 (!%p143_p10), %v468_v0  ;;  %s324_s4 = sshll.u32 (!%p143_p10), %s167_s3, 3 }
  0x10   : > { %v183_v12 = vshrl.u32 (!%p143_p10), %v182_v10, 7  ;;  %s328_s5 = sshll.u32 (!%p143_p10), %s458_s12, 7  ;;  %s169_s6 = scalar_lea.vmem (!%p143_p10), [#allocation2], %s324_s4 }
  0x11   : > { %s236_s7 = sshll.u32 (!%p143_p10), %s169_s6, 4  ;;  %s555_s16 = scalar_lea.hbm (!%p143_p10), %s605_s2, %s328_s5  ;;  %s557_s7 = int_to_ptr.vmem [resolvable:$true] %s236_s7 }
  0x12   : > { %v209_v20 = vsub.s32 (!%p143_p10), 0, %v183_v12  ;;  %vm205_vm6 = vcmp.eq.s32.totalorder (!%p143_p10), %v183_v12, 0  ;;  %s222_s18 = scalar_lea.sflag (!%p143_p10), [#allocation3], %s167_s3  ;;  %s469_s20 = smov (!%p143_p10), [#allocation2]  }
  0x16   : > { %s171_s23 = scalar_select %p170_p11, %s458_s12, 3 }
  0x17   : > { %s388_s12 = scalar_lea.vmem %s557_s7, 128 }
  0x18   : > { %s325_s24 = sshll.u32 %s171_s23, 3  ;;  %p389_p12 = scmp.ne.s32.totalorder %s557_s7, %s388_s12 }
  0x19   : > { %s180_s27 = scalar_lea.vmem %s604_s1, %s325_s24  ;;  %s176_s30 = scalar_lea.vmem %s603_s0, %s325_s24 }
  0x1a   : > { %v212_v1 = vld [vmem:[%s180_s27] sm:$0xff]  ;;  %p390_p13 = pnand %p389_p12, %p525_p4  ;;  %s392_s23 = sshll.u32 %s469_s20, 4  ;;  %s393_s23 = int_to_ptr.vmem [resolvable:$false] %s392_s23 }
  0x1b   : > { %vm213_vm0 = vcmp.ne.s32.totalorder %v212_v1, 0  ;;  %v181_v3 = vld [vmem:[%s176_s30] sm:$0xff]  ;;  %s394_s24 = scalar_lea.vmem %s393_s23, 256  ;;  %p395_p1 = scmp.lt.s32.totalorder %s557_s7, %s393_s23 }
  0x1c   : > { %v214_v2 = vsel %vm213_vm0, 1, %v468_v0  ;;  %v185_v4 = vsel %vm184_vm1, %v181_v3, -inf  ;;  %v210_v22 = vrot.slane %v181_v3, %v209_v20  ;;  %p391_p0 = pneg %p390_p13  ;;  %p396_p2 = scmp.lt.s32.totalorder %s394_s24, %s388_s12 }
  0x1d   : > { %216 = vperm.xlu0 %387, %v214_v2   ;;  %v186_v5 = vrot.slane %v185_v4, 4 }
  0x1e   : > { %p397_p3 = por %p396_p2, %p395_p1 }
  0x1f   : > { %v187_v6 = vmax.f32 %v185_v4, %v186_v5 }
  0x20   : > { %p398_p5 = pnand %p397_p3, %p391_p0 }
  0x21   : > { %v188_v7 = vrot.slane %v187_v6, 2 }
  0x23   : > { %v189_v8 = vmax.f32 %v187_v6, %v188_v7 }
  0x25   : > { %v190_v9 = vrot.slane %v189_v8, 1 }
  0x27   : > { %v191_v11 = vmax.f32 %v189_v8, %v190_v9 }
  0x29   : > { %vm192_vm2 = vcmp.eq.f32.partialorder %v181_v3, %v191_v11  ;;  %v206_v23 = vsel %vm205_vm6, %v191_v11, %v181_v3 }
  0x2a   : > { %v193_v13 = vsel %vm192_vm2, %v183_v12, 8 }
  0x2b   : > { %v194_v14 = vsel %vm184_vm1, %v193_v13, 2147483647 }
  0x2c   : > { %v195_v15 = vrot.slane %v194_v14, 4 }
  0x2e   : > { %vm196_vm3 = vcmp.lt.s32.totalorder %v194_v14, %v195_v15 }
  0x2f   : > { %v197_v16 = vsel %vm196_vm3, %v194_v14, %v195_v15 }
  0x30   : > { %v198_v17 = vrot.slane %v197_v16, 2 }
  0x32   : > { %vm199_vm4 = vcmp.lt.s32.totalorder %v197_v16, %v198_v17 }
  0x33   : > { %v200_v18 = vsel %vm199_vm4, %v197_v16, %v198_v17 }
  0x34   : > { %v201_v19 = vrot.slane %v200_v18, 1 }
  0x36   : > { %vm202_vm5 = vcmp.lt.s32.totalorder %v200_v18, %v201_v19 }
  0x37   : > { %v203_v21 = vsel %vm202_vm5, %v200_v18, %v201_v19 }
  0x38   : > { %vm204_vm7 = vcmp.eq.s32.totalorder %v183_v12, %v203_v21 }
  0x39   : > { %v211_v24 = vsel %vm204_vm7, %v210_v22, %v206_v23 }
  0x9c   : > { %v217_v25 = vpop.permute.xlu0 %216 }
  0x9d   : > { %vm218_vm8 = vcmp.eq.s32.totalorder %v217_v25, 1 }
  0x9e   : > { %v219_v26 = vsel %vm218_vm8, 0.0, %v211_v24 }
  0x9f   : > { %220 = vst.msk [vmem:[%s169_s6] sm:$0xff] %vm184_vm1, %v219_v26 }
  0xa0   : > { %401 = shalt.err (!%p398_p5)
}
  0xa1   : > { %s402_s25 = scalar_lea.hbm %s555_s16, 128  ;;  %s406_s28 = scalar_lea.hbm %s605_s2, 512 }
  0xa2   : > { %p403_p6 = scmp.ne.s32.totalorder %s555_s16, %s402_s25  ;;  %p407_p10 = scmp.lt.u32.totalorder %s555_s16, %s605_s2 }
  0xa3   : > { %p408_p11 = scmp.lt.u32.totalorder %s406_s28, %s402_s25  ;;  %p410_p13 = scmp.lt.u32.totalorder %s402_s25, %s555_s16 }
  0xa4   : > { %p404_p7 = pnand %p403_p6, %p525_p4 }
  0xa5   : > { %p409_p12 = por %p408_p11, %p407_p10 }
  0xa6   : > { %p405_p9 = pneg %p404_p7 }
  0xa7   : > { %p411_p0 = por %p410_p13, %p409_p12 }
  0xa9   : > { %p412_p1 = pnand %p411_p0, %p405_p9 }
  0xab   : > { %415 = shalt.err (!%p412_p1)
}
  0xac   : > { %331 = dma.vmem_to_hbm [thread:$0]  (%p525_p4), %s557_s7, 128, %s555_s16, %s222_s18  }
  0xad PF: > { %p337_p2 = scmp.ge.s32.totalorder %s466_s14, 2  ;;  %s248_s3 = sand.u32 1, %s446_s9  }
  0xae   : > { %s249_s4 = scalar_lea.sflag [#allocation3], %s248_s3 }
  0xaf   : > { %p334_p3 = pnand %p337_p2, %p532_p8 }
  0xb1   : > { %441 = dma.done.wait (!%p334_p3), %s249_s4, 128  }
  0xb2   : > { %443 = vsyncadd (!%p334_p3), %s249_s4, 4294967168  ;;  %s15_s14 = sadd.s32 1, %s466_s14   ;;  %s608_s9 = smov %s450_s10 }
  0xb3   : > { %p12_p5 = scmp.ge.s32.totalorder %s15_s14, 6   ;;  %s609_s10 = smov %s454_s11 }
  0xb4   : > { %s610_s11 = smov %s538_s22  ;;  %s611_s12 = smov %s462_s13 }
  0xb5   : > { %s612_s13 = smov %s614_s17  ;;  %14 = sbr.rel (!%p12_p5) target bundleno = 4 (0x4), region = 66 }
  0xbc   :  { %254 = vsyncpa [#allocation3], 1 }
  0xbd   :  { %256 = vsyncpa [#allocation3 + $0x1], 1 }

</bundles_post_ra>
